<compile_context>
chip_gen: v6e
topology: v6e:2x2x1
jax: 0.10.0
libtpu: 0.0.40
codegen_flags: <defaults>
</compile_context>

<pallas_src>
import jax
import jax.numpy as jnp
from jax.experimental import pallas as pl
from jax.experimental.pallas import tpu as pltpu


def attn_kernel(x_ref, v_ref, attn_ref, ctx_ref):
    # One batch row per grid step.
    # x_ref:    (1, S, D)  decoder outputs for this batch row
    # v_ref:    (1, D)     folded score vector (weight_vec @ lin_w), shared
    # attn_ref: (1, 1, S)  softmax attention weights (f32), lane-major
    # ctx_ref:  (1, 1, D)  fused context vector attn @ x
    x = x_ref[0]                                             # (S, D)

    # scores[0, s] = sum_d v[0, d] * x[s, d]  -> (1, S), lane-major for the
    # softmax. NOTE: both operands contract their lane axis (NT form); at
    # S=8, D=64 any relayout Mosaic inserts is negligible. For long S, prefer
    # x @ v^T with a sublane-major score vector (see review) before scaling up.
    scores = jax.lax.dot_general(
        v_ref[...], x,
        dimension_numbers=(((1,), (1,)), ((), ())),
        preferred_element_type=jnp.float32)                  # (1, S) f32

    # numerically-stable softmax over the sequence (lane) axis — exact divide
    m = jnp.max(scores, axis=-1, keepdims=True)
    e = jnp.exp(scores - m)
    denom = jnp.sum(e, axis=-1, keepdims=True)
    p = e / denom                                            # sums to 1 exactly
    attn_ref[0] = p

    # Fused downstream context bmm: x is already resident in VMEM.
    ctx = jnp.dot(p.astype(x.dtype), x, preferred_element_type=jnp.float32)
    ctx_ref[0] = ctx.astype(ctx_ref.dtype)


def fold_params(lin_w, weight_vec, dtype=jnp.float32):
    """One-time parameter fold (hoisted out of the per-call path).

    lin_w:      (D, D) PyTorch nn.Linear weight layout (out_features, in_features)
    weight_vec: (1, D)
    Returns v_row (1, D) with v_row = weight_vec @ lin_w, so
    score(x) = v_row . x + const, and the const (weight_vec . bias) cancels
    under softmax — the bias is dropped exactly.
    """
    D = lin_w.shape[0]
    return (weight_vec.reshape(1, D) @ lin_w).astype(dtype)


def attn_forward_batched(outputs, v_row):
    """outputs: (B, S, D) float (f32 or bf16); v_row: (1, D) from fold_params
    (same dtype as outputs).
    Returns (attn (B, 1, S) f32, ctx (B, 1, D) outputs.dtype)."""
    B, S, D = outputs.shape
    v_row = v_row.astype(outputs.dtype)

    # TODO(synk): for long encoder sequences, tile S with an extra grid axis +
    # online softmax (flash-style m/l scratch) so 2x(double-buffer) x S*D*dtype
    # fits v7x's 64 MiB VMEM instead of raising vmem_limit_bytes.
    grid_spec = pltpu.PrefetchScalarGridSpec(
        num_scalar_prefetch=0,
        grid=(B,),
        in_specs=[
            pl.BlockSpec((1, S, D), lambda b: (b, 0, 0)),    # per-row x tile
            pl.BlockSpec((1, D), lambda b: (0, 0)),          # shared v
        ],
        out_specs=[
            pl.BlockSpec((1, 1, S), lambda b: (b, 0, 0)),
            pl.BlockSpec((1, 1, D), lambda b: (b, 0, 0)),
        ],
    )
    attn, ctx = pl.pallas_call(
        attn_kernel,
        out_shape=(
            jax.ShapeDtypeStruct((B, 1, S), jnp.float32),
            jax.ShapeDtypeStruct((B, 1, D), outputs.dtype),
        ),
        grid_spec=grid_spec,
        compiler_params=pltpu.CompilerParams(
            dimension_semantics=("parallel",)),              # megacore on v7x
    )(outputs, v_row)
    return attn, ctx


def attn_forward(outputs, v_row):
    """Module-exact path: outputs (S, D) -> (1, 1, S) attention weights,
    matching F.softmax(energies).unsqueeze(0).unsqueeze(0). The fused context
    vector is also produced but discarded here."""
    S, D = outputs.shape
    attn, _ctx = attn_forward_batched(outputs.reshape(1, S, D), v_row)
    return attn.reshape(1, 1, S)


if __name__ == "__main__":
    # Small shapes consistent with the module: hidden=32 -> D = 2H = 64, seq=8
    hidden = 32
    D = hidden * 2
    S = 8
    B = 4

    key = jax.random.PRNGKey(0)
    k1, k2, k3, k4 = jax.random.split(key, 4)

    outputs_b = jax.random.normal(k1, (B, S, D), dtype=jnp.float32)
    # Deterministic synthetic parameters (not a checkpoint load)
    lin_w = jax.random.normal(k2, (D, D), dtype=jnp.float32) * 0.05
    lin_b = jax.random.normal(k3, (D,), dtype=jnp.float32) * 0.05
    weight_vec = jax.random.normal(k4, (1, D), dtype=jnp.float32) * 0.05

    # One-time parameter fold (hoisted out of the per-step path).
    v_row = fold_params(lin_w, weight_vec, dtype=outputs_b.dtype)

    attn, ctx = attn_forward_batched(outputs_b, v_row)
    attn, ctx = jax.block_until_ready((attn, ctx))

    # Reference: the original un-folded PyTorch math (full Linear WITH bias),
    # softmax over the sequence axis — verifies the fold/bias-drop is exact.
    energy = jnp.einsum('bsd,ed->bse', outputs_b, lin_w) + lin_b   # nn.Linear
    scores_ref = jnp.einsum('bse,e->bs', energy, weight_vec.reshape(-1))
    ref_attn = jax.nn.softmax(scores_ref, axis=-1)                 # (B, S)
    ref_ctx = jnp.einsum('bs,bsd->bd', ref_attn, outputs_b)        # (B, D)

    assert attn.shape == (B, 1, S) and ctx.shape == (B, 1, D)
    assert jnp.allclose(jnp.sum(attn, axis=-1), 1.0, atol=1e-5)
    assert jnp.allclose(attn.reshape(B, S), ref_attn, rtol=1e-4, atol=1e-5)
    assert jnp.allclose(ctx.reshape(B, D), ref_ctx, rtol=1e-4, atol=1e-4)

    # Module-exact single-sequence path: (S, D) -> (1, 1, S).
    attn1 = jax.block_until_ready(attn_forward(outputs_b[0], v_row))
    assert attn1.shape == (1, 1, S)
    assert jnp.allclose(attn1.reshape(S), ref_attn[0], rtol=1e-4, atol=1e-5)

    print("KERNEL_OK")
</pallas_src>

<mosaic_0001>
module attributes {stable_mosaic.version = 11 : i64} {
  func.func @attn_kernel(%arg0: i32, %arg1: memref<1x8x64xf32, #tpu.memory_space<vmem>>, %arg2: memref<1x64xf32, #tpu.memory_space<vmem>>, %arg3: memref<1x1x8xf32, #tpu.memory_space<vmem>>, %arg4: memref<1x1x64xf32, #tpu.memory_space<vmem>>) attributes {dimension_semantics = [#tpu.dimension_semantics<parallel>], iteration_bounds = array<i64: 4>, scalar_prefetch = 0 : i64, scratch_operands = 0 : i64, tpu.core_type = #tpu.core_type<tc>, window_params = [{transform_indices = @transform_0, window_bounds = array<i64: 1, 8, 64>}, {pipeline_mode = #tpu.pipeline_mode<synchronous>, transform_indices = @transform_1, window_bounds = array<i64: 1, 64>}, {transform_indices = @transform_2, window_bounds = array<i64: 1, 1, 8>}, {transform_indices = @transform_3, window_bounds = array<i64: 1, 1, 64>}]} {
    %c0 = arith.constant 0 : index
    %c0_0 = arith.constant 0 : index
    %c0_1 = arith.constant 0 : index
    %0 = vector.load %arg1[%c0, %c0_0, %c0_1] : memref<1x8x64xf32, #tpu.memory_space<vmem>>, vector<1x8x64xf32>
    %1 = vector.shape_cast %0 : vector<1x8x64xf32> to vector<8x64xf32>
    %c0_2 = arith.constant 0 : index
    %c0_3 = arith.constant 0 : index
    %2 = vector.load %arg2[%c0_2, %c0_3] : memref<1x64xf32, #tpu.memory_space<vmem>>, vector<1x64xf32>
    %cst = arith.constant dense<0.000000e+00> : vector<1x8xf32>
    %3 = tpu.matmul %2, %1, %cst {dimension_numbers = #tpu.dot_dimension_numbers<[1], [1], [0], [0], [0, 0, 1, 0], [], []>} : vector<1x64xf32>, vector<8x64xf32>, vector<1x8xf32> -> vector<1x8xf32>
    %cst_4 = arith.constant dense<0xFF800000> : vector<1xf32>
    %4 = vector.multi_reduction <maximumf>, %3, %cst_4 [1] : vector<1x8xf32> to vector<1xf32>
    %5 = vector.shape_cast %4 : vector<1xf32> to vector<1x1xf32>
    %6 = vector.broadcast %5 : vector<1x1xf32> to vector<1x8xf32>
    %7 = arith.subf %3, %6 : vector<1x8xf32>
    %8 = math.exp %7 : vector<1x8xf32>
    %cst_5 = arith.constant dense<0.000000e+00> : vector<1xf32>
    %9 = vector.multi_reduction <add>, %8, %cst_5 [1] : vector<1x8xf32> to vector<1xf32>
    %10 = vector.shape_cast %9 : vector<1xf32> to vector<1x1xf32>
    %11 = vector.broadcast %10 : vector<1x1xf32> to vector<1x8xf32>
    %12 = arith.divf %8, %11 : vector<1x8xf32>
    %c0_6 = arith.constant 0 : index
    %c0_7 = arith.constant 0 : index
    %c0_8 = arith.constant 0 : index
    %13 = vector.load %arg3[%c0_6, %c0_7, %c0_8] : memref<1x1x8xf32, #tpu.memory_space<vmem>>, vector<1x1x8xf32>
    %14 = vector.shape_cast %13 : vector<1x1x8xf32> to vector<1x8xf32>
    %15 = vector.shape_cast %12 : vector<1x8xf32> to vector<1x1x8xf32>
    tpu.vector_store %arg3[%c0_6, %c0_7, %c0_8], %15 {strides = array<i32>} : memref<1x1x8xf32, #tpu.memory_space<vmem>>, vector<1x1x8xf32>,
    %cst_9 = arith.constant dense<0.000000e+00> : vector<1x64xf32>
    %16 = tpu.matmul %12, %1, %cst_9 {dimension_numbers = #tpu.dot_dimension_numbers<[1], [0], [0], [1], [0, 0, 1, 1], [], []>} : vector<1x8xf32>, vector<8x64xf32>, vector<1x64xf32> -> vector<1x64xf32>
    %c0_10 = arith.constant 0 : index
    %c0_11 = arith.constant 0 : index
    %c0_12 = arith.constant 0 : index
    %17 = vector.load %arg4[%c0_10, %c0_11, %c0_12] : memref<1x1x64xf32, #tpu.memory_space<vmem>>, vector<1x1x64xf32>
    %18 = vector.shape_cast %17 : vector<1x1x64xf32> to vector<1x64xf32>
    %19 = vector.shape_cast %16 : vector<1x64xf32> to vector<1x1x64xf32>
    tpu.vector_store %arg4[%c0_10, %c0_11, %c0_12], %19 {strides = array<i32>} : memref<1x1x64xf32, #tpu.memory_space<vmem>>, vector<1x1x64xf32>,
    return
  }
  func.func @transform_0(%arg0: i32) -> (i32, i32, i32) {
    %c0_i32 = arith.constant 0 : i32
    %c0_i32_0 = arith.constant 0 : i32
    %c0_i32_1 = arith.constant 0 : i32
    return %arg0, %c0_i32, %c0_i32_0 : i32, i32, i32
  }
  func.func @transform_1(%arg0: i32) -> (i32, i32) {
    %c0_i32 = arith.constant 0 : i32
    %c0_i32_0 = arith.constant 0 : i32
    %c0_i32_1 = arith.constant 0 : i32
    return %c0_i32, %c0_i32_0 : i32, i32
  }
  func.func @transform_2(%arg0: i32) -> (i32, i32, i32) {
    %c0_i32 = arith.constant 0 : i32
    %c0_i32_0 = arith.constant 0 : i32
    %c0_i32_1 = arith.constant 0 : i32
    return %arg0, %c0_i32, %c0_i32_0 : i32, i32, i32
  }
  func.func @transform_3(%arg0: i32) -> (i32, i32, i32) {
    %c0_i32 = arith.constant 0 : i32
    %c0_i32_0 = arith.constant 0 : i32
    %c0_i32_1 = arith.constant 0 : i32
    return %arg0, %c0_i32, %c0_i32_0 : i32, i32, i32
  }
}

</mosaic_0001>

<bundles_post_ra>
// kernel: tpu_custom_call.1
= control target key start
LH: loop header
LB: loop body
LE: loop exit
PB: predicated region body
PF: predicated region fallthrough
CT: control target
= control target key end

     0   :  { %9 = vsyncpa [#allocation3], 0  ;;  %s900_s0 = inlined_call_operand.hbm [shape: f32[4,8,64], index: 0, kind: input, shape index: {}]   ;;  %s901_s1 = inlined_call_operand.vmem [shape: f32[1,64], index: 1, kind: input, shape index: {}]   ;;  %s902_s2 = inlined_call_operand.hbm [shape: f32[4,1,8], index: 2, kind: output, shape index: {0}]   ;;  %s903_s3 = inlined_call_operand.hbm [shape: f32[4,1,64], index: 3, kind: output, shape index: {1}]  }
   0x1   :  { %11 = vsyncpa [#allocation3 + $0x1], 0 }
   0x2   :  { %12 = vsyncpa [#allocation4], 0 }
   0x3   :  { %14 = vsyncpa [#allocation4 + $0x1], 0 }
   0x4   :  { %15 = vsyncpa [#allocation7], 0 }
   0x5   :  { %17 = vsyncpa [#allocation7 + $0x1], 0  ;;  %s721_s12 = smov 0   ;;  %s723_s13 = smov 0  }
   0x6   :  { %s725_s14 = smov 0   ;;  %s727_s15 = smov 0  }
   0x7 LB: > { %s742_s16 = sadd.s32 4294967295, %s694_s15   ;;  %s487_s17 = sadd.s32 4294967294, %s694_s15   ;;  %s694_s15 = sphi %s727_s15, %s919_s15   ;;  %s690_s14 = sphi %s725_s14, %s918_s14   ;;  %s686_s13 = sphi %s723_s13, %s917_s13   ;;  %s682_s12 = sphi %s721_s12, %s916_s12  }
   0x8   : > { %s746_s18 = sadd.s32 1, %s694_s15   ;;  %s30_s19 = sadd.s32 1, %s690_s14 }
   0x9   : > { %s27_s20 = ssub.s32 %s694_s15, %s746_s18  ;;  %p37_p0 = scmp.ne.s32.totalorder %s690_s14, %s686_s13 }
   0xa   : > { %p28_p1 = scmp.eq.s32.totalorder %s27_s20, 0  ;;  %p38_p2 = scmp.eq.s32.totalorder %s694_s15, 0 }
   0xb   : > { %p43_p3 = scmp.ne.s32.totalorder %s686_s13, %s682_s12  ;;  %p44_p4 = scmp.eq.s32.totalorder %s742_s16, 0 }
   0xc   : > { %s758_s21 = scalar_select %p28_p1, %s690_s14, %s30_s19  }
   0xd   : > { %p760_p5 = por %p38_p2, %p37_p0  ;;  %p764_p6 = por %p44_p4, %p43_p3 }
   0xe   : > { %p88_p7 = scmp.eq.s32.totalorder %s742_s16, 3  ;;  %p94_p8 = scmp.eq.s32.totalorder %s487_s17, 3 }
   0xf   : > { %s907_s23 = scalar_select %p764_p6, 1, 0 }
  0x10   : > { %p532_p9 = scmp.lt.s32.totalorder %s694_s15, 4  ;;  %p770_p10 = por %p88_p7, %p37_p0 }
  0x11   : > { %p774_p11 = por %p94_p8, %p43_p3  ;;  %s143_s26 = sand.u32 1, %s690_s14  }
  0x12   : > { %s908_s24 = scalar_select %p770_p10, 1, 0 }
  0x13   : > { %s909_s25 = scalar_select %p774_p11, 1, 0 }
  0x14   : > { %s491_s27 = sshll.u32 %s694_s15, 7  ;;  %s490_s28 = sshll.u32 %s143_s26, 3 }
  0x15   : > { %s783_s4 = scalar_lea.hbm %s900_s0, %s491_s27  ;;  %s147_s5 = scalar_lea.vmem [#allocation2], %s490_s28 }
  0x16   : > { %s154_s6 = sshll.u32 %s147_s5, 4  ;;  %p787_p12 = pnand %p532_p9, %p760_p5  ;;  %s791_s6 = int_to_ptr.vmem [resolvable:$true] %s154_s6 }
  0x17   : > { %s144_s8 = scalar_lea.sflag [#allocation3], %s143_s26  ;;  %s572_s9 = scalar_lea.hbm %s783_s4, 128 }
  0x18   : > { %p573_p1 = scmp.ne.s32.totalorder %s783_s4, %s572_s9  ;;  %p574_p2 = pneg %p787_p12 }
  0x19   : > { %s577_s17 = scalar_lea.hbm %s900_s0, 512  ;;  %p578_p5 = scmp.lt.s32.totalorder %s783_s4, %s900_s0 }
  0x1a   : > { %p575_p3 = pnand %p574_p2, %p573_p1  ;;  %p579_p7 = scmp.lt.s32.totalorder %s577_s17, %s572_s9 }
  0x1c   : > { %p576_p4 = pneg %p575_p3  ;;  %p580_p8 = por %p579_p7, %p578_p5 }
  0x1e   : > { %p581_p9 = pnand %p580_p8, %p576_p4 }
  0x20   : > { %584 = shalt.err (!%p581_p9)
}
  0x21   : > { %s585_s22 = scalar_lea.vmem %s791_s6, 128  ;;  %s696_s26 = smov [#allocation2]  }
  0x22   : > { %p586_p13 = scmp.ne.s32.totalorder %s791_s6, %s585_s22  ;;  %s590_s27 = sshll.u32 %s696_s26, 4  ;;  %s591_s27 = int_to_ptr.vmem [resolvable:$false] %s590_s27 }
  0x23   : > { %s592_s28 = scalar_lea.vmem %s591_s27, 256  ;;  %p593_p3 = scmp.lt.s32.totalorder %s791_s6, %s591_s27 }
  0x24   : > { %p588_p0 = pnand %p586_p13, %p574_p2  ;;  %p594_p11 = scmp.lt.s32.totalorder %s592_s28, %s585_s22 }
  0x26   : > { %p589_p1 = pneg %p588_p0  ;;  %p595_p10 = por %p594_p11, %p593_p3 }
  0x28   : > { %p596_p6 = pnand %p595_p10, %p589_p1 }
  0x2a   : > { %599 = shalt.err (!%p596_p6)
}
  0x2b   : > { %524 = dma.hbm_to_vmem [thread:$0]  (!%p787_p12), %s783_s4, 128, %s791_s6, %s144_s8  }
  0x2c   : > { %p911_p4 = scmp.lt.s32.totalorder %s694_s15, 5  ;;  %p912_p5 = scmp.ge.s32.totalorder %s694_s15, 1 }
  0x2e   : > { %p160_p13 = pnand %p912_p5, %p911_p4 }
  0x2f   : > { %s818_s29 = sand.u32 (!%p160_p13), 1, %s686_s13   ;;  %p913_p6 = scmp.ne.s32.totalorder (!%p160_p13), %s907_s23, 0 }
  0x30   : > { %163 = sbr.rel (%p160_p13) target bundleno = 772 (0x304), region = 28  ;;  %s493_s30 = sshll.u32 (!%p160_p13), %s818_s29, 3 }
  0x31   : > { %s166_s5 = scalar_lea.sflag (!%p160_p13), [#allocation3], %s818_s29  ;;  %s169_s9 = scalar_lea.vmem (!%p160_p13), [#allocation2], %s493_s30 }
  0x35   : > { %669 = dma.done.wait (%p913_p6), %s166_s5, 128  }
  0x36   : > { %671 = vsyncadd (%p913_p6), %s166_s5, 4294967168  ;;  %v697_v0 = vmov 0.0   ;;  %vm698_vm0 = vmmov 0   ;;  %vm197_vm1 = vcmask 523264   ;;  %v195_v1 = vld [vmem:[%s169_s9] sm:$0xff]  ;;  %vm274_vm2 = vcmask 57344  }
  0x37   : > { %505 = vmatprep.subr.mxu0 %v697_v0  ;;  %507 = vmatprep.mubr.msk.f32.mxu0 %vm698_vm0, %v697_v0  ;;  %v196_v2 = vld [vmem:[%s901_s1] sm:$0x1]  ;;  %vm287_vm3 = vcmask 64512   ;;  %s188_s23 = scalar_lea.vmem [#allocation5], %s818_s29  ;;  %s497_s7 = sshll.u32 %s742_s16, 4 }
  0x38   : > { %510 = vmatprep.subr.mxu1 %v697_v0  ;;  %512 = vmatprep.mubr.msk.f32.mxu1 %vm698_vm0, %v697_v0  ;;  %s380_s8 = sshll.u32 %s188_s23, 4  ;;  %s378_s17 = scalar_lea.hbm %s902_s2, %s497_s7  ;;  %s381_s8 = int_to_ptr.vmem [resolvable:$true] %s380_s8 }
  0x39   : > { %506 = vmatpush3.xpose.msk.msra.mxu0 %vm197_vm1, %v195_v1  ;;  %511 = vmatpush3.msra.mxu1 %v195_v1  ;;  %s364_s19 = scalar_lea.sflag [#allocation4], %s818_s29  ;;  %s600_s20 = scalar_lea.vmem %s381_s8, 16 }
  0x3a   : > { %p601_p10 = scmp.ne.s32.totalorder %s381_s8, %s600_s20  ;;  %p914_p11 = scmp.ne.s32.totalorder %s908_s24, 0 }
  0x3b   : > { %s699_s22 = smov [#allocation5]  }
  0x3c   : > { %508 = vmatmul.mubr.msk.f32.vlgmr.msra.gmra.mxu0 %vm197_vm1, %v196_v2  ;;  %p602_p12 = pnand %p601_p10, %p914_p11  ;;  %s604_s26 = sshll.u32 %s699_s22, 4  ;;  %s605_s26 = int_to_ptr.vmem [resolvable:$false] %s604_s26 }
  0x3d   : > { %s606_s27 = scalar_lea.vmem %s605_s26, 32  ;;  %p607_p2 = scmp.lt.s32.totalorder %s381_s8, %s605_s26 }
  0x3e   : > { %p603_p0 = pneg %p602_p12  ;;  %p608_p7 = scmp.lt.s32.totalorder %s606_s27, %s600_s20 }
  0x40   : > { %p609_p8 = por %p608_p7, %p607_p2 }
  0x42   : > { %p610_p9 = pnand %p609_p8, %p603_p0 }
  0xfc   : > { %v270_v3 = vpop.f32.mrf.mxu0 }
  0xfd   : > { %v275_v4 = vsel %vm274_vm2, %v270_v3, -inf }
  0xfe   : > { %276 = vmax.xlane.f32.xlu0 %v275_v4  ;;  %v509_v5 = vpop.f32.mrf.mxu0 }
 0x187   : > { %v277_v6 = vpop.xlane.xlu0 %276 }
 0x188   : > { %v278_v7 = vsub.f32 %v270_v3, %v277_v6 }
 0x18a   : > { %v279_v8 = vmul.f32 1.442695, %v278_v7 }
 0x18c   : > { %568 = vpow2.f32 %v279_v8 }
 0x199   : > { %v569_v9 = vpop.eup %568 }
 0x19a   : > { %v281_v10 = vsel %vm274_vm2, %v569_v9, 0.0 }
 0x19b   : > { %282 = vadd.xlane.f32.xlu0 %v281_v10 }
 0x224   : > { %v283_v11 = vpop.xlane.xlu0 %282 }
 0x225   : > { %570 = vrcp.f32 %v283_v11 }
 0x232   : > { %v571_v12 = vpop.eup %570 }
 0x233   : > { %v285_v13 = vmul.f32 %v571_v12, %v569_v9 }
 0x235   : > { %513 = vmatmul.mubr.msk.f32.vlgmr.msra.gmra.mxu1 %vm287_vm3, %v285_v13  ;;  %286 = vst.msk [vmem:[%s188_s23] sm:$0x1] %vm274_vm2, %v285_v13 }
 0x236   : > { %613 = shalt.err (!%p610_p9)
}
 0x237   : > { %s614_s28 = scalar_lea.hbm %s378_s17, 16  ;;  %s618_s9 = scalar_lea.hbm %s902_s2, 64 }
 0x238   : > { %p615_p1 = scmp.ne.s32.totalorder %s378_s17, %s614_s28  ;;  %p619_p5 = scmp.lt.s32.totalorder %s378_s17, %s902_s2 }
 0x239   : > { %p620_p13 = scmp.lt.s32.totalorder %s618_s9, %s614_s28 }
 0x23a   : > { %p616_p3 = pnand %p615_p1, %p914_p11 }
 0x23b   : > { %p621_p6 = por %p620_p13, %p619_p5 }
 0x23c   : > { %p617_p4 = pneg %p616_p3 }
 0x23e   : > { %p622_p10 = pnand %p621_p6, %p617_p4 }
 0x240   : > { %625 = shalt.err (!%p622_p10)
}
 0x241   : > { %517 = dma.vmem_to_hbm [thread:$0]  (%p914_p11), %s381_s8, 16, %s378_s17, %s364_s19   ;;  %vm361_vm4 = vcmask 516096  }
 0x242   : > { %s194_s23 = scalar_lea.vmem [#allocation6], %s818_s29  ;;  %s858_s22 = scalar_lea.hbm %s903_s3, %s497_s7 }
 0x243   : > { %s393_s10 = sshll.u32 %s194_s23, 4  ;;  %s368_s26 = scalar_lea.sflag [#allocation7], %s818_s29  ;;  %s860_s10 = int_to_ptr.vmem [resolvable:$true] %s393_s10 }
 0x244   : > { %s626_s27 = scalar_lea.vmem %s860_s10, 16  ;;  %s700_s16 = smov [#allocation6]  }
 0x245   : > { %p627_p12 = scmp.ne.s32.totalorder %s860_s10, %s626_s27  ;;  %s630_s8 = sshll.u32 %s700_s16, 4  ;;  %s631_s8 = int_to_ptr.vmem [resolvable:$false] %s630_s8 }
 0x246   : > { %s632_s17 = scalar_lea.vmem %s631_s8, 32  ;;  %p633_p7 = scmp.lt.s32.totalorder %s860_s10, %s631_s8 }
 0x247   : > { %p628_p0 = pnand %p627_p12, %p914_p11  ;;  %p634_p8 = scmp.lt.s32.totalorder %s632_s17, %s626_s27 }
 0x249   : > { %p629_p2 = pneg %p628_p0  ;;  %p635_p9 = por %p634_p8, %p633_p7 }
 0x24b   : > { %p636_p1 = pnand %p635_p9, %p629_p2 }
 0x2f5   : > { %v357_v14 = vpop.f32.mrf.mxu1 }
 0x2f6   : > { %362 = vst.msk [vmem:[%s194_s23] sm:$0x1] %vm361_vm4, %v357_v14 }
 0x2f7   : > { %v514_v15 = vpop.f32.mrf.mxu1 }
 0x2f8   : > { %639 = shalt.err (!%p636_p1)
}
 0x2f9   : > { %s640_s7 = scalar_lea.hbm %s858_s22, 16  ;;  %s644_s28 = scalar_lea.hbm %s903_s3, 64 }
 0x2fa   : > { %p641_p3 = scmp.ne.s32.totalorder %s858_s22, %s640_s7  ;;  %p645_p13 = scmp.lt.s32.totalorder %s858_s22, %s903_s3 }
 0x2fb   : > { %p646_p6 = scmp.lt.s32.totalorder %s644_s28, %s640_s7 }
 0x2fc   : > { %p642_p4 = pnand %p641_p3, %p914_p11 }
 0x2fd   : > { %p647_p10 = por %p646_p6, %p645_p13 }
 0x2fe   : > { %p643_p5 = pneg %p642_p4 }
 0x300   : > { %p648_p12 = pnand %p647_p10, %p643_p5 }
 0x302   : > { %651 = shalt.err (!%p648_p12)
}
 0x303   : > { %518 = dma.vmem_to_hbm [thread:$0]  (%p914_p11), %s860_s10, 16, %s858_s22, %s368_s26  }
 0x304 PF: > { %p533_p0 = scmp.ge.s32.totalorder %s694_s15, 2  ;;  %s405_s9 = sand.u32 1, %s682_s12  }
 0x305   : > { %p915_p2 = scmp.ne.s32.totalorder %s909_s25, 0  ;;  %s406_s4 = scalar_lea.sflag [#allocation4], %s405_s9 }
 0x307   : > { %p526_p7 = pnand %p533_p0, %p915_p2 }
 0x309   : > { %p527_p8 = pneg %p526_p7 }
 0x30b   : > { %673 = dma.done.wait (%p527_p8), %s406_s4, 16  }
 0x30c   : > { %675 = vsyncadd (%p527_p8), %s406_s4, 4294967280  ;;  %s414_s6 = scalar_lea.sflag [#allocation7], %s405_s9 }
 0x30d   : > { %677 = dma.done.wait (%p527_p8), %s414_s6, 16  }
 0x30e   : > { %679 = vsyncadd (%p527_p8), %s414_s6, 4294967280  ;;  %p20_p11 = scmp.ge.s32.totalorder %s746_s18, 6   ;;  %s916_s12 = smov %s686_s13 }
 0x30f   : > { %s917_s13 = smov %s690_s14  ;;  %s918_s14 = smov %s758_s21 }
 0x310   : > { %s919_s15 = smov %s746_s18  ;;  %22 = sbr.rel (!%p20_p11) target bundleno = 7 (0x7), region = 90 }
 0x315   :  { %418 = vsyncpa [#allocation3], 1 }
 0x316   :  { %420 = vsyncpa [#allocation3 + $0x1], 1 }
 0x317   :  { %421 = vsyncpa [#allocation4], 1 }
 0x318   :  { %423 = vsyncpa [#allocation4 + $0x1], 1 }
 0x319   :  { %424 = vsyncpa [#allocation7], 1 }
 0x31a   :  { %426 = vsyncpa [#allocation7 + $0x1], 1 }

</bundles_post_ra>
